<compile_context>
chip_gen: v7x
topology: tpu7x:2x2x1
jax: 0.10.0
libtpu: 0.0.40
codegen_flags: <defaults>
</compile_context>

<pallas_src>
import functools

import jax
import jax.numpy as jnp
from jax.experimental import pallas as pl
from jax.experimental.pallas import tpu as pltpu


def _round_up(x, m):
    return ((x + m - 1) // m) * m


def _pick_tb_block(TB, per_img_bytes, vmem_budget):
    """Largest divisor of TB whose double-buffered block footprint fits the
    budget, preferring >= 2 grid steps (pipelining + v7x megacore)."""
    cap = max(1, vmem_budget // max(2 * per_img_bytes, 1))
    divisors = [d for d in range(1, TB + 1) if TB % d == 0 and d <= cap]
    if not divisors:
        return 1
    multi_step = [d for d in divisors if TB // d >= 2]
    return max(multi_step) if multi_step else max(divisors)


def _split2patch_kernel(x_ref, o_ref, *, h, w, p1, tb_blk):
    """Patchify `tb_blk` images per grid step.

    x_ref: (tb_blk, H*w, p2*C)  channels-last pixels with (p2, C) folded into
                                lanes; row index = img_row*w + wcol,
                                lane index = (col % p2)*C + c.
    o_ref: (tb_blk, N, P)       patches; N = h*w, P = p1*p2*C.
    """
    # TODO(synk): for large images (e.g. 224px / p=16) switch the (img, a) loops
    # to lax.fori_loop with pl.multiple_of'd pl.ds offsets to bound code size
    # and vreg live ranges; static unroll is ideal for these small configs.
    for img in range(tb_blk):
        for a in range(h):                              # patch-row index
            # p1 contiguous (w, p2*C) source row-blocks -> one (w, P) slab.
            chunks = [
                x_ref[img, (a * p1 + u) * w:(a * p1 + u + 1) * w, :]
                for u in range(p1)
            ]
            slab = chunks[0] if p1 == 1 else jnp.concatenate(chunks, axis=-1)
            # Single lane-dense store per patch-row block.
            o_ref[img, a * w:(a + 1) * w, :] = slab


def split2patch(z, patch_size):
    """z: (T, B, C, H, W) -> (T, B, N, P) patches, matching the PyTorch module."""
    T, B, C, H, W = z.shape
    p1, p2 = patch_size
    assert H % p1 == 0 and W % p2 == 0, (
        "Image dimensions must be divisible by the patch size.")
    h, w = H // p1, W // p2
    N, P = h * w, p1 * p2 * C
    TB = T * B

    # Layout plumbing (wrapper side): channels-last, then fold (p2, C) into the
    # lane axis.  (H, W, C) -> (H*w, p2*C) is a contiguous (zero-cost) reshape,
    # so the kernel only needs unit-stride block copies.
    # TODO(synk): for very large inputs, fold this transpose into the kernel
    # (read native (C, H, W) blocks + in-VMEM relayout) to save one HBM pass.
    z_cl = jnp.transpose(z, (0, 1, 3, 4, 2)).reshape(TB, H * w, p2 * C)

    # Images per grid step: amortize the ~0.35us/step overhead while keeping the
    # padded, double-buffered footprint well under scoped VMEM (v7x-safe).
    itemsize = jnp.dtype(z.dtype).itemsize
    per_img_bytes = itemsize * (
        _round_up(H * w, 8) * _round_up(p2 * C, 128)
        + _round_up(N, 8) * _round_up(P, 128))
    tb_blk = _pick_tb_block(TB, per_img_bytes, vmem_budget=16 << 20)

    kernel = functools.partial(
        _split2patch_kernel, h=h, w=w, p1=p1, tb_blk=tb_blk)

    out = pl.pallas_call(
        kernel,
        out_shape=jax.ShapeDtypeStruct((TB, N, P), z.dtype),
        grid=(TB // tb_blk,),
        in_specs=[pl.BlockSpec((tb_blk, H * w, p2 * C), lambda i: (i, 0, 0))],
        out_specs=pl.BlockSpec((tb_blk, N, P), lambda i: (i, 0, 0)),
        compiler_params=pltpu.CompilerParams(
            # NOTE: if profiling on v7x shows one TC idle, switch to
            # pltpu.CORE_PARALLEL for the image axis.
            dimension_semantics=("parallel",),
        ),
    )(z_cl)
    return out.reshape(T, B, N, P)


def split2patch_reference(z, patch_size):
    """Pure-JAX reference of the einops rearrange, used only for validation."""
    T, B, C, H, W = z.shape
    p1, p2 = patch_size
    h, w = H // p1, W // p2
    z = z.reshape(T, B, C, h, p1, w, p2)
    z = jnp.transpose(z, (0, 1, 3, 5, 4, 6, 2))      # t b h w p1 p2 c
    return z.reshape(T, B, h * w, p1 * p2 * C)


if __name__ == "__main__":
    key = jax.random.PRNGKey(0)

    # Config 1: RGB-like, 16x16 image, 4x4 patches -> N=16, P=48.
    T, B, C, H, W = 4, 2, 3, 16, 16
    patch = (4, 4)
    z1 = jax.random.normal(key, (T, B, C, H, W), dtype=jnp.float32)
    out1 = jax.block_until_ready(split2patch(z1, patch))
    ref1 = split2patch_reference(z1, patch)
    assert out1.shape == (T, B, (H // patch[0]) * (W // patch[1]),
                          patch[0] * patch[1] * C), out1.shape
    assert bool(jnp.array_equal(out1, ref1)), "Pallas output mismatches reference (cfg 1)"

    # Config 2: different channel count / rectangular patch, checks generality.
    T2, B2, C2, H2, W2 = 2, 3, 4, 8, 16
    patch2 = (2, 4)
    z2 = jax.random.normal(jax.random.PRNGKey(0), (T2, B2, C2, H2, W2),
                           dtype=jnp.float32)
    out2 = jax.block_until_ready(split2patch(z2, patch2))
    ref2 = split2patch_reference(z2, patch2)
    assert out2.shape == (T2, B2, (H2 // patch2[0]) * (W2 // patch2[1]),
                          patch2[0] * patch2[1] * C2), out2.shape
    assert bool(jnp.array_equal(out2, ref2)), "Pallas output mismatches reference (cfg 2)"

    print("KERNEL_OK")
</pallas_src>

<mosaic_0001>
module attributes {stable_mosaic.version = 11 : i64} {
  func.func @_split2patch_kernel(%arg0: i32, %arg1: memref<4x64x12xf32, #tpu.memory_space<vmem>>, %arg2: memref<4x16x48xf32, #tpu.memory_space<vmem>>) attributes {dimension_semantics = [#tpu.dimension_semantics<parallel>], iteration_bounds = array<i64: 2>, scalar_prefetch = 0 : i64, scratch_operands = 0 : i64, tpu.core_type = #tpu.core_type<tc>, window_params = [{transform_indices = @transform_0, window_bounds = array<i64: 4, 64, 12>}, {transform_indices = @transform_1, window_bounds = array<i64: 4, 16, 48>}]} {
    %c0 = arith.constant 0 : index
    %c0_0 = arith.constant 0 : index
    %c0_1 = arith.constant 0 : index
    %0 = vector.load %arg1[%c0, %c0_0, %c0_1] : memref<4x64x12xf32, #tpu.memory_space<vmem>>, vector<1x4x12xf32>
    %1 = vector.shape_cast %0 : vector<1x4x12xf32> to vector<4x12xf32>
    %c0_2 = arith.constant 0 : index
    %c4 = arith.constant 4 : index
    %c0_3 = arith.constant 0 : index
    %2 = vector.load %arg1[%c0_2, %c4, %c0_3] : memref<4x64x12xf32, #tpu.memory_space<vmem>>, vector<1x4x12xf32>
    %3 = vector.shape_cast %2 : vector<1x4x12xf32> to vector<4x12xf32>
    %c0_4 = arith.constant 0 : index
    %c8 = arith.constant 8 : index
    %c0_5 = arith.constant 0 : index
    %4 = vector.load %arg1[%c0_4, %c8, %c0_5] : memref<4x64x12xf32, #tpu.memory_space<vmem>>, vector<1x4x12xf32>
    %5 = vector.shape_cast %4 : vector<1x4x12xf32> to vector<4x12xf32>
    %c0_6 = arith.constant 0 : index
    %c12 = arith.constant 12 : index
    %c0_7 = arith.constant 0 : index
    %6 = vector.load %arg1[%c0_6, %c12, %c0_7] : memref<4x64x12xf32, #tpu.memory_space<vmem>>, vector<1x4x12xf32>
    %7 = vector.shape_cast %6 : vector<1x4x12xf32> to vector<4x12xf32>
    %8 = tpu.concatenate %1, %3, %5, %7 in 1 : vector<4x12xf32>, vector<4x12xf32>, vector<4x12xf32>, vector<4x12xf32> -> vector<4x48xf32>
    %c0_8 = arith.constant 0 : index
    %c0_9 = arith.constant 0 : index
    %c0_10 = arith.constant 0 : index
    %9 = vector.load %arg2[%c0_8, %c0_9, %c0_10] : memref<4x16x48xf32, #tpu.memory_space<vmem>>, vector<1x4x48xf32>
    %10 = vector.shape_cast %9 : vector<1x4x48xf32> to vector<4x48xf32>
    %11 = vector.shape_cast %8 : vector<4x48xf32> to vector<1x4x48xf32>
    tpu.vector_store %arg2[%c0_8, %c0_9, %c0_10], %11 {strides = array<i32>} : memref<4x16x48xf32, #tpu.memory_space<vmem>>, vector<1x4x48xf32>,
    %c0_11 = arith.constant 0 : index
    %c16 = arith.constant 16 : index
    %c0_12 = arith.constant 0 : index
    %12 = vector.load %arg1[%c0_11, %c16, %c0_12] : memref<4x64x12xf32, #tpu.memory_space<vmem>>, vector<1x4x12xf32>
    %13 = vector.shape_cast %12 : vector<1x4x12xf32> to vector<4x12xf32>
    %c0_13 = arith.constant 0 : index
    %c20 = arith.constant 20 : index
    %c0_14 = arith.constant 0 : index
    %14 = vector.load %arg1[%c0_13, %c20, %c0_14] : memref<4x64x12xf32, #tpu.memory_space<vmem>>, vector<1x4x12xf32>
    %15 = vector.shape_cast %14 : vector<1x4x12xf32> to vector<4x12xf32>
    %c0_15 = arith.constant 0 : index
    %c24 = arith.constant 24 : index
    %c0_16 = arith.constant 0 : index
    %16 = vector.load %arg1[%c0_15, %c24, %c0_16] : memref<4x64x12xf32, #tpu.memory_space<vmem>>, vector<1x4x12xf32>
    %17 = vector.shape_cast %16 : vector<1x4x12xf32> to vector<4x12xf32>
    %c0_17 = arith.constant 0 : index
    %c28 = arith.constant 28 : index
    %c0_18 = arith.constant 0 : index
    %18 = vector.load %arg1[%c0_17, %c28, %c0_18] : memref<4x64x12xf32, #tpu.memory_space<vmem>>, vector<1x4x12xf32>
    %19 = vector.shape_cast %18 : vector<1x4x12xf32> to vector<4x12xf32>
    %20 = tpu.concatenate %13, %15, %17, %19 in 1 : vector<4x12xf32>, vector<4x12xf32>, vector<4x12xf32>, vector<4x12xf32> -> vector<4x48xf32>
    %c0_19 = arith.constant 0 : index
    %c4_20 = arith.constant 4 : index
    %c0_21 = arith.constant 0 : index
    %21 = vector.load %arg2[%c0_19, %c4_20, %c0_21] : memref<4x16x48xf32, #tpu.memory_space<vmem>>, vector<1x4x48xf32>
    %22 = vector.shape_cast %21 : vector<1x4x48xf32> to vector<4x48xf32>
    %23 = vector.shape_cast %20 : vector<4x48xf32> to vector<1x4x48xf32>
    tpu.vector_store %arg2[%c0_19, %c4_20, %c0_21], %23 {strides = array<i32>} : memref<4x16x48xf32, #tpu.memory_space<vmem>>, vector<1x4x48xf32>,
    %c0_22 = arith.constant 0 : index
    %c32 = arith.constant 32 : index
    %c0_23 = arith.constant 0 : index
    %24 = vector.load %arg1[%c0_22, %c32, %c0_23] : memref<4x64x12xf32, #tpu.memory_space<vmem>>, vector<1x4x12xf32>
    %25 = vector.shape_cast %24 : vector<1x4x12xf32> to vector<4x12xf32>
    %c0_24 = arith.constant 0 : index
    %c36 = arith.constant 36 : index
    %c0_25 = arith.constant 0 : index
    %26 = vector.load %arg1[%c0_24, %c36, %c0_25] : memref<4x64x12xf32, #tpu.memory_space<vmem>>, vector<1x4x12xf32>
    %27 = vector.shape_cast %26 : vector<1x4x12xf32> to vector<4x12xf32>
    %c0_26 = arith.constant 0 : index
    %c40 = arith.constant 40 : index
    %c0_27 = arith.constant 0 : index
    %28 = vector.load %arg1[%c0_26, %c40, %c0_27] : memref<4x64x12xf32, #tpu.memory_space<vmem>>, vector<1x4x12xf32>
    %29 = vector.shape_cast %28 : vector<1x4x12xf32> to vector<4x12xf32>
    %c0_28 = arith.constant 0 : index
    %c44 = arith.constant 44 : index
    %c0_29 = arith.constant 0 : index
    %30 = vector.load %arg1[%c0_28, %c44, %c0_29] : memref<4x64x12xf32, #tpu.memory_space<vmem>>, vector<1x4x12xf32>
    %31 = vector.shape_cast %30 : vector<1x4x12xf32> to vector<4x12xf32>
    %32 = tpu.concatenate %25, %27, %29, %31 in 1 : vector<4x12xf32>, vector<4x12xf32>, vector<4x12xf32>, vector<4x12xf32> -> vector<4x48xf32>
    %c0_30 = arith.constant 0 : index
    %c8_31 = arith.constant 8 : index
    %c0_32 = arith.constant 0 : index
    %33 = vector.load %arg2[%c0_30, %c8_31, %c0_32] : memref<4x16x48xf32, #tpu.memory_space<vmem>>, vector<1x4x48xf32>
    %34 = vector.shape_cast %33 : vector<1x4x48xf32> to vector<4x48xf32>
    %35 = vector.shape_cast %32 : vector<4x48xf32> to vector<1x4x48xf32>
    tpu.vector_store %arg2[%c0_30, %c8_31, %c0_32], %35 {strides = array<i32>} : memref<4x16x48xf32, #tpu.memory_space<vmem>>, vector<1x4x48xf32>,
    %c0_33 = arith.constant 0 : index
    %c48 = arith.constant 48 : index
    %c0_34 = arith.constant 0 : index
    %36 = vector.load %arg1[%c0_33, %c48, %c0_34] : memref<4x64x12xf32, #tpu.memory_space<vmem>>, vector<1x4x12xf32>
    %37 = vector.shape_cast %36 : vector<1x4x12xf32> to vector<4x12xf32>
    %c0_35 = arith.constant 0 : index
    %c52 = arith.constant 52 : index
    %c0_36 = arith.constant 0 : index
    %38 = vector.load %arg1[%c0_35, %c52, %c0_36] : memref<4x64x12xf32, #tpu.memory_space<vmem>>, vector<1x4x12xf32>
    %39 = vector.shape_cast %38 : vector<1x4x12xf32> to vector<4x12xf32>
    %c0_37 = arith.constant 0 : index
    %c56 = arith.constant 56 : index
    %c0_38 = arith.constant 0 : index
    %40 = vector.load %arg1[%c0_37, %c56, %c0_38] : memref<4x64x12xf32, #tpu.memory_space<vmem>>, vector<1x4x12xf32>
    %41 = vector.shape_cast %40 : vector<1x4x12xf32> to vector<4x12xf32>
    %c0_39 = arith.constant 0 : index
    %c60 = arith.constant 60 : index
    %c0_40 = arith.constant 0 : index
    %42 = vector.load %arg1[%c0_39, %c60, %c0_40] : memref<4x64x12xf32, #tpu.memory_space<vmem>>, vector<1x4x12xf32>
    %43 = vector.shape_cast %42 : vector<1x4x12xf32> to vector<4x12xf32>
    %44 = tpu.concatenate %37, %39, %41, %43 in 1 : vector<4x12xf32>, vector<4x12xf32>, vector<4x12xf32>, vector<4x12xf32> -> vector<4x48xf32>
    %c0_41 = arith.constant 0 : index
    %c12_42 = arith.constant 12 : index
    %c0_43 = arith.constant 0 : index
    %45 = vector.load %arg2[%c0_41, %c12_42, %c0_43] : memref<4x16x48xf32, #tpu.memory_space<vmem>>, vector<1x4x48xf32>
    %46 = vector.shape_cast %45 : vector<1x4x48xf32> to vector<4x48xf32>
    %47 = vector.shape_cast %44 : vector<4x48xf32> to vector<1x4x48xf32>
    tpu.vector_store %arg2[%c0_41, %c12_42, %c0_43], %47 {strides = array<i32>} : memref<4x16x48xf32, #tpu.memory_space<vmem>>, vector<1x4x48xf32>,
    %c1 = arith.constant 1 : index
    %c0_44 = arith.constant 0 : index
    %c0_45 = arith.constant 0 : index
    %48 = vector.load %arg1[%c1, %c0_44, %c0_45] : memref<4x64x12xf32, #tpu.memory_space<vmem>>, vector<1x4x12xf32>
    %49 = vector.shape_cast %48 : vector<1x4x12xf32> to vector<4x12xf32>
    %c1_46 = arith.constant 1 : index
    %c4_47 = arith.constant 4 : index
    %c0_48 = arith.constant 0 : index
    %50 = vector.load %arg1[%c1_46, %c4_47, %c0_48] : memref<4x64x12xf32, #tpu.memory_space<vmem>>, vector<1x4x12xf32>
    %51 = vector.shape_cast %50 : vector<1x4x12xf32> to vector<4x12xf32>
    %c1_49 = arith.constant 1 : index
    %c8_50 = arith.constant 8 : index
    %c0_51 = arith.constant 0 : index
    %52 = vector.load %arg1[%c1_49, %c8_50, %c0_51] : memref<4x64x12xf32, #tpu.memory_space<vmem>>, vector<1x4x12xf32>
    %53 = vector.shape_cast %52 : vector<1x4x12xf32> to vector<4x12xf32>
    %c1_52 = arith.constant 1 : index
    %c12_53 = arith.constant 12 : index
    %c0_54 = arith.constant 0 : index
    %54 = vector.load %arg1[%c1_52, %c12_53, %c0_54] : memref<4x64x12xf32, #tpu.memory_space<vmem>>, vector<1x4x12xf32>
    %55 = vector.shape_cast %54 : vector<1x4x12xf32> to vector<4x12xf32>
    %56 = tpu.concatenate %49, %51, %53, %55 in 1 : vector<4x12xf32>, vector<4x12xf32>, vector<4x12xf32>, vector<4x12xf32> -> vector<4x48xf32>
    %c1_55 = arith.constant 1 : index
    %c0_56 = arith.constant 0 : index
    %c0_57 = arith.constant 0 : index
    %57 = vector.load %arg2[%c1_55, %c0_56, %c0_57] : memref<4x16x48xf32, #tpu.memory_space<vmem>>, vector<1x4x48xf32>
    %58 = vector.shape_cast %57 : vector<1x4x48xf32> to vector<4x48xf32>
    %59 = vector.shape_cast %56 : vector<4x48xf32> to vector<1x4x48xf32>
    tpu.vector_store %arg2[%c1_55, %c0_56, %c0_57], %59 {strides = array<i32>} : memref<4x16x48xf32, #tpu.memory_space<vmem>>, vector<1x4x48xf32>,
    %c1_58 = arith.constant 1 : index
    %c16_59 = arith.constant 16 : index
    %c0_60 = arith.constant 0 : index
    %60 = vector.load %arg1[%c1_58, %c16_59, %c0_60] : memref<4x64x12xf32, #tpu.memory_space<vmem>>, vector<1x4x12xf32>
    %61 = vector.shape_cast %60 : vector<1x4x12xf32> to vector<4x12xf32>
    %c1_61 = arith.constant 1 : index
    %c20_62 = arith.constant 20 : index
    %c0_63 = arith.constant 0 : index
    %62 = vector.load %arg1[%c1_61, %c20_62, %c0_63] : memref<4x64x12xf32, #tpu.memory_space<vmem>>, vector<1x4x12xf32>
    %63 = vector.shape_cast %62 : vector<1x4x12xf32> to vector<4x12xf32>
    %c1_64 = arith.constant 1 : index
    %c24_65 = arith.constant 24 : index
    %c0_66 = arith.constant 0 : index
    %64 = vector.load %arg1[%c1_64, %c24_65, %c0_66] : memref<4x64x12xf32, #tpu.memory_space<vmem>>, vector<1x4x12xf32>
    %65 = vector.shape_cast %64 : vector<1x4x12xf32> to vector<4x12xf32>
    %c1_67 = arith.constant 1 : index
    %c28_68 = arith.constant 28 : index
    %c0_69 = arith.constant 0 : index
    %66 = vector.load %arg1[%c1_67, %c28_68, %c0_69] : memref<4x64x12xf32, #tpu.memory_space<vmem>>, vector<1x4x12xf32>
    %67 = vector.shape_cast %66 : vector<1x4x12xf32> to vector<4x12xf32>
    %68 = tpu.concatenate %61, %63, %65, %67 in 1 : vector<4x12xf32>, vector<4x12xf32>, vector<4x12xf32>, vector<4x12xf32> -> vector<4x48xf32>
    %c1_70 = arith.constant 1 : index
    %c4_71 = arith.constant 4 : index
    %c0_72 = arith.constant 0 : index
    %69 = vector.load %arg2[%c1_70, %c4_71, %c0_72] : memref<4x16x48xf32, #tpu.memory_space<vmem>>, vector<1x4x48xf32>
    %70 = vector.shape_cast %69 : vector<1x4x48xf32> to vector<4x48xf32>
    %71 = vector.shape_cast %68 : vector<4x48xf32> to vector<1x4x48xf32>
    tpu.vector_store %arg2[%c1_70, %c4_71, %c0_72], %71 {strides = array<i32>} : memref<4x16x48xf32, #tpu.memory_space<vmem>>, vector<1x4x48xf32>,
    %c1_73 = arith.constant 1 : index
    %c32_74 = arith.constant 32 : index
    %c0_75 = arith.constant 0 : index
    %72 = vector.load %arg1[%c1_73, %c32_74, %c0_75] : memref<4x64x12xf32, #tpu.memory_space<vmem>>, vector<1x4x12xf32>
    %73 = vector.shape_cast %72 : vector<1x4x12xf32> to vector<4x12xf32>
    %c1_76 = arith.constant 1 : index
    %c36_77 = arith.constant 36 : index
    %c0_78 = arith.constant 0 : index
    %74 = vector.load %arg1[%c1_76, %c36_77, %c0_78] : memref<4x64x12xf32, #tpu.memory_space<vmem>>, vector<1x4x12xf32>
    %75 = vector.shape_cast %74 : vector<1x4x12xf32> to vector<4x12xf32>
    %c1_79 = arith.constant 1 : index
    %c40_80 = arith.constant 40 : index
    %c0_81 = arith.constant 0 : index
    %76 = vector.load %arg1[%c1_79, %c40_80, %c0_81] : memref<4x64x12xf32, #tpu.memory_space<vmem>>, vector<1x4x12xf32>
    %77 = vector.shape_cast %76 : vector<1x4x12xf32> to vector<4x12xf32>
    %c1_82 = arith.constant 1 : index
    %c44_83 = arith.constant 44 : index
    %c0_84 = arith.constant 0 : index
    %78 = vector.load %arg1[%c1_82, %c44_83, %c0_84] : memref<4x64x12xf32, #tpu.memory_space<vmem>>, vector<1x4x12xf32>
    %79 = vector.shape_cast %78 : vector<1x4x12xf32> to vector<4x12xf32>
    %80 = tpu.concatenate %73, %75, %77, %79 in 1 : vector<4x12xf32>, vector<4x12xf32>, vector<4x12xf32>, vector<4x12xf32> -> vector<4x48xf32>
    %c1_85 = arith.constant 1 : index
    %c8_86 = arith.constant 8 : index
    %c0_87 = arith.constant 0 : index
    %81 = vector.load %arg2[%c1_85, %c8_86, %c0_87] : memref<4x16x48xf32, #tpu.memory_space<vmem>>, vector<1x4x48xf32>
    %82 = vector.shape_cast %81 : vector<1x4x48xf32> to vector<4x48xf32>
    %83 = vector.shape_cast %80 : vector<4x48xf32> to vector<1x4x48xf32>
    tpu.vector_store %arg2[%c1_85, %c8_86, %c0_87], %83 {strides = array<i32>} : memref<4x16x48xf32, #tpu.memory_space<vmem>>, vector<1x4x48xf32>,
    %c1_88 = arith.constant 1 : index
    %c48_89 = arith.constant 48 : index
    %c0_90 = arith.constant 0 : index
    %84 = vector.load %arg1[%c1_88, %c48_89, %c0_90] : memref<4x64x12xf32, #tpu.memory_space<vmem>>, vector<1x4x12xf32>
    %85 = vector.shape_cast %84 : vector<1x4x12xf32> to vector<4x12xf32>
    %c1_91 = arith.constant 1 : index
    %c52_92 = arith.constant 52 : index
    %c0_93 = arith.constant 0 : index
    %86 = vector.load %arg1[%c1_91, %c52_92, %c0_93] : memref<4x64x12xf32, #tpu.memory_space<vmem>>, vector<1x4x12xf32>
    %87 = vector.shape_cast %86 : vector<1x4x12xf32> to vector<4x12xf32>
    %c1_94 = arith.constant 1 : index
    %c56_95 = arith.constant 56 : index
    %c0_96 = arith.constant 0 : index
    %88 = vector.load %arg1[%c1_94, %c56_95, %c0_96] : memref<4x64x12xf32, #tpu.memory_space<vmem>>, vector<1x4x12xf32>
    %89 = vector.shape_cast %88 : vector<1x4x12xf32> to vector<4x12xf32>
    %c1_97 = arith.constant 1 : index
    %c60_98 = arith.constant 60 : index
    %c0_99 = arith.constant 0 : index
    %90 = vector.load %arg1[%c1_97, %c60_98, %c0_99] : memref<4x64x12xf32, #tpu.memory_space<vmem>>, vector<1x4x12xf32>
    %91 = vector.shape_cast %90 : vector<1x4x12xf32> to vector<4x12xf32>
    %92 = tpu.concatenate %85, %87, %89, %91 in 1 : vector<4x12xf32>, vector<4x12xf32>, vector<4x12xf32>, vector<4x12xf32> -> vector<4x48xf32>
    %c1_100 = arith.constant 1 : index
    %c12_101 = arith.constant 12 : index
    %c0_102 = arith.constant 0 : index
    %93 = vector.load %arg2[%c1_100, %c12_101, %c0_102] : memref<4x16x48xf32, #tpu.memory_space<vmem>>, vector<1x4x48xf32>
    %94 = vector.shape_cast %93 : vector<1x4x48xf32> to vector<4x48xf32>
    %95 = vector.shape_cast %92 : vector<4x48xf32> to vector<1x4x48xf32>
    tpu.vector_store %arg2[%c1_100, %c12_101, %c0_102], %95 {strides = array<i32>} : memref<4x16x48xf32, #tpu.memory_space<vmem>>, vector<1x4x48xf32>,
    %c2 = arith.constant 2 : index
    %c0_103 = arith.constant 0 : index
    %c0_104 = arith.constant 0 : index
    %96 = vector.load %arg1[%c2, %c0_103, %c0_104] : memref<4x64x12xf32, #tpu.memory_space<vmem>>, vector<1x4x12xf32>
    %97 = vector.shape_cast %96 : vector<1x4x12xf32> to vector<4x12xf32>
    %c2_105 = arith.constant 2 : index
    %c4_106 = arith.constant 4 : index
    %c0_107 = arith.constant 0 : index
    %98 = vector.load %arg1[%c2_105, %c4_106, %c0_107] : memref<4x64x12xf32, #tpu.memory_space<vmem>>, vector<1x4x12xf32>
    %99 = vector.shape_cast %98 : vector<1x4x12xf32> to vector<4x12xf32>
    %c2_108 = arith.constant 2 : index
    %c8_109 = arith.constant 8 : index
    %c0_110 = arith.constant 0 : index
    %100 = vector.load %arg1[%c2_108, %c8_109, %c0_110] : memref<4x64x12xf32, #tpu.memory_space<vmem>>, vector<1x4x12xf32>
    %101 = vector.shape_cast %100 : vector<1x4x12xf32> to vector<4x12xf32>
    %c2_111 = arith.constant 2 : index
    %c12_112 = arith.constant 12 : index
    %c0_113 = arith.constant 0 : index
    %102 = vector.load %arg1[%c2_111, %c12_112, %c0_113] : memref<4x64x12xf32, #tpu.memory_space<vmem>>, vector<1x4x12xf32>
    %103 = vector.shape_cast %102 : vector<1x4x12xf32> to vector<4x12xf32>
    %104 = tpu.concatenate %97, %99, %101, %103 in 1 : vector<4x12xf32>, vector<4x12xf32>, vector<4x12xf32>, vector<4x12xf32> -> vector<4x48xf32>
    %c2_114 = arith.constant 2 : index
    %c0_115 = arith.constant 0 : index
    %c0_116 = arith.constant 0 : index
    %105 = vector.load %arg2[%c2_114, %c0_115, %c0_116] : memref<4x16x48xf32, #tpu.memory_space<vmem>>, vector<1x4x48xf32>
    %106 = vector.shape_cast %105 : vector<1x4x48xf32> to vector<4x48xf32>
    %107 = vector.shape_cast %104 : vector<4x48xf32> to vector<1x4x48xf32>
    tpu.vector_store %arg2[%c2_114, %c0_115, %c0_116], %107 {strides = array<i32>} : memref<4x16x48xf32, #tpu.memory_space<vmem>>, vector<1x4x48xf32>,
    %c2_117 = arith.constant 2 : index
    %c16_118 = arith.constant 16 : index
    %c0_119 = arith.constant 0 : index
    %108 = vector.load %arg1[%c2_117, %c16_118, %c0_119] : memref<4x64x12xf32, #tpu.memory_space<vmem>>, vector<1x4x12xf32>
    %109 = vector.shape_cast %108 : vector<1x4x12xf32> to vector<4x12xf32>
    %c2_120 = arith.constant 2 : index
    %c20_121 = arith.constant 20 : index
    %c0_122 = arith.constant 0 : index
    %110 = vector.load %arg1[%c2_120, %c20_121, %c0_122] : memref<4x64x12xf32, #tpu.memory_space<vmem>>, vector<1x4x12xf32>
    %111 = vector.shape_cast %110 : vector<1x4x12xf32> to vector<4x12xf32>
    %c2_123 = arith.constant 2 : index
    %c24_124 = arith.constant 24 : index
    %c0_125 = arith.constant 0 : index
    %112 = vector.load %arg1[%c2_123, %c24_124, %c0_125] : memref<4x64x12xf32, #tpu.memory_space<vmem>>, vector<1x4x12xf32>
    %113 = vector.shape_cast %112 : vector<1x4x12xf32> to vector<4x12xf32>
    %c2_126 = arith.constant 2 : index
    %c28_127 = arith.constant 28 : index
    %c0_128 = arith.constant 0 : index
    %114 = vector.load %arg1[%c2_126, %c28_127, %c0_128] : memref<4x64x12xf32, #tpu.memory_space<vmem>>, vector<1x4x12xf32>
    %115 = vector.shape_cast %114 : vector<1x4x12xf32> to vector<4x12xf32>
    %116 = tpu.concatenate %109, %111, %113, %115 in 1 : vector<4x12xf32>, vector<4x12xf32>, vector<4x12xf32>, vector<4x12xf32> -> vector<4x48xf32>
    %c2_129 = arith.constant 2 : index
    %c4_130 = arith.constant 4 : index
    %c0_131 = arith.constant 0 : index
    %117 = vector.load %arg2[%c2_129, %c4_130, %c0_131] : memref<4x16x48xf32, #tpu.memory_space<vmem>>, vector<1x4x48xf32>
    %118 = vector.shape_cast %117 : vector<1x4x48xf32> to vector<4x48xf32>
    %119 = vector.shape_cast %116 : vector<4x48xf32> to vector<1x4x48xf32>
    tpu.vector_store %arg2[%c2_129, %c4_130, %c0_131], %119 {strides = array<i32>} : memref<4x16x48xf32, #tpu.memory_space<vmem>>, vector<1x4x48xf32>,
    %c2_132 = arith.constant 2 : index
    %c32_133 = arith.constant 32 : index
    %c0_134 = arith.constant 0 : index
    %120 = vector.load %arg1[%c2_132, %c32_133, %c0_134] : memref<4x64x12xf32, #tpu.memory_space<vmem>>, vector<1x4x12xf32>
    %121 = vector.shape_cast %120 : vector<1x4x12xf32> to vector<4x12xf32>
    %c2_135 = arith.constant 2 : index
    %c36_136 = arith.constant 36 : index
    %c0_137 = arith.constant 0 : index
    %122 = vector.load %arg1[%c2_135, %c36_136, %c0_137] : memref<4x64x12xf32, #tpu.memory_space<vmem>>, vector<1x4x12xf32>
    %123 = vector.shape_cast %122 : vector<1x4x12xf32> to vector<4x12xf32>
    %c2_138 = arith.constant 2 : index
    %c40_139 = arith.constant 40 : index
    %c0_140 = arith.constant 0 : index
    %124 = vector.load %arg1[%c2_138, %c40_139, %c0_140] : memref<4x64x12xf32, #tpu.memory_space<vmem>>, vector<1x4x12xf32>
    %125 = vector.shape_cast %124 : vector<1x4x12xf32> to vector<4x12xf32>
    %c2_141 = arith.constant 2 : index
    %c44_142 = arith.constant 44 : index
    %c0_143 = arith.constant 0 : index
    %126 = vector.load %arg1[%c2_141, %c44_142, %c0_143] : memref<4x64x12xf32, #tpu.memory_space<vmem>>, vector<1x4x12xf32>
    %127 = vector.shape_cast %126 : vector<1x4x12xf32> to vector<4x12xf32>
    %128 = tpu.concatenate %121, %123, %125, %127 in 1 : vector<4x12xf32>, vector<4x12xf32>, vector<4x12xf32>, vector<4x12xf32> -> vector<4x48xf32>
    %c2_144 = arith.constant 2 : index
    %c8_145 = arith.constant 8 : index
    %c0_146 = arith.constant 0 : index
    %129 = vector.load %arg2[%c2_144, %c8_145, %c0_146] : memref<4x16x48xf32, #tpu.memory_space<vmem>>, vector<1x4x48xf32>
    %130 = vector.shape_cast %129 : vector<1x4x48xf32> to vector<4x48xf32>
    %131 = vector.shape_cast %128 : vector<4x48xf32> to vector<1x4x48xf32>
    tpu.vector_store %arg2[%c2_144, %c8_145, %c0_146], %131 {strides = array<i32>} : memref<4x16x48xf32, #tpu.memory_space<vmem>>, vector<1x4x48xf32>,
    %c2_147 = arith.constant 2 : index
    %c48_148 = arith.constant 48 : index
    %c0_149 = arith.constant 0 : index
    %132 = vector.load %arg1[%c2_147, %c48_148, %c0_149] : memref<4x64x12xf32, #tpu.memory_space<vmem>>, vector<1x4x12xf32>
    %133 = vector.shape_cast %132 : vector<1x4x12xf32> to vector<4x12xf32>
    %c2_150 = arith.constant 2 : index
    %c52_151 = arith.constant 52 : index
    %c0_152 = arith.constant 0 : index
    %134 = vector.load %arg1[%c2_150, %c52_151, %c0_152] : memref<4x64x12xf32, #tpu.memory_space<vmem>>, vector<1x4x12xf32>
    %135 = vector.shape_cast %134 : vector<1x4x12xf32> to vector<4x12xf32>
    %c2_153 = arith.constant 2 : index
    %c56_154 = arith.constant 56 : index
    %c0_155 = arith.constant 0 : index
    %136 = vector.load %arg1[%c2_153, %c56_154, %c0_155] : memref<4x64x12xf32, #tpu.memory_space<vmem>>, vector<1x4x12xf32>
    %137 = vector.shape_cast %136 : vector<1x4x12xf32> to vector<4x12xf32>
    %c2_156 = arith.constant 2 : index
    %c60_157 = arith.constant 60 : index
    %c0_158 = arith.constant 0 : index
    %138 = vector.load %arg1[%c2_156, %c60_157, %c0_158] : memref<4x64x12xf32, #tpu.memory_space<vmem>>, vector<1x4x12xf32>
    %139 = vector.shape_cast %138 : vector<1x4x12xf32> to vector<4x12xf32>
    %140 = tpu.concatenate %133, %135, %137, %139 in 1 : vector<4x12xf32>, vector<4x12xf32>, vector<4x12xf32>, vector<4x12xf32> -> vector<4x48xf32>
    %c2_159 = arith.constant 2 : index
    %c12_160 = arith.constant 12 : index
    %c0_161 = arith.constant 0 : index
    %141 = vector.load %arg2[%c2_159, %c12_160, %c0_161] : memref<4x16x48xf32, #tpu.memory_space<vmem>>, vector<1x4x48xf32>
    %142 = vector.shape_cast %141 : vector<1x4x48xf32> to vector<4x48xf32>
    %143 = vector.shape_cast %140 : vector<4x48xf32> to vector<1x4x48xf32>
    tpu.vector_store %arg2[%c2_159, %c12_160, %c0_161], %143 {strides = array<i32>} : memref<4x16x48xf32, #tpu.memory_space<vmem>>, vector<1x4x48xf32>,
    %c3 = arith.constant 3 : index
    %c0_162 = arith.constant 0 : index
    %c0_163 = arith.constant 0 : index
    %144 = vector.load %arg1[%c3, %c0_162, %c0_163] : memref<4x64x12xf32, #tpu.memory_space<vmem>>, vector<1x4x12xf32>
    %145 = vector.shape_cast %144 : vector<1x4x12xf32> to vector<4x12xf32>
    %c3_164 = arith.constant 3 : index
    %c4_165 = arith.constant 4 : index
    %c0_166 = arith.constant 0 : index
    %146 = vector.load %arg1[%c3_164, %c4_165, %c0_166] : memref<4x64x12xf32, #tpu.memory_space<vmem>>, vector<1x4x12xf32>
    %147 = vector.shape_cast %146 : vector<1x4x12xf32> to vector<4x12xf32>
    %c3_167 = arith.constant 3 : index
    %c8_168 = arith.constant 8 : index
    %c0_169 = arith.constant 0 : index
    %148 = vector.load %arg1[%c3_167, %c8_168, %c0_169] : memref<4x64x12xf32, #tpu.memory_space<vmem>>, vector<1x4x12xf32>
    %149 = vector.shape_cast %148 : vector<1x4x12xf32> to vector<4x12xf32>
    %c3_170 = arith.constant 3 : index
    %c12_171 = arith.constant 12 : index
    %c0_172 = arith.constant 0 : index
    %150 = vector.load %arg1[%c3_170, %c12_171, %c0_172] : memref<4x64x12xf32, #tpu.memory_space<vmem>>, vector<1x4x12xf32>
    %151 = vector.shape_cast %150 : vector<1x4x12xf32> to vector<4x12xf32>
    %152 = tpu.concatenate %145, %147, %149, %151 in 1 : vector<4x12xf32>, vector<4x12xf32>, vector<4x12xf32>, vector<4x12xf32> -> vector<4x48xf32>
    %c3_173 = arith.constant 3 : index
    %c0_174 = arith.constant 0 : index
    %c0_175 = arith.constant 0 : index
    %153 = vector.load %arg2[%c3_173, %c0_174, %c0_175] : memref<4x16x48xf32, #tpu.memory_space<vmem>>, vector<1x4x48xf32>
    %154 = vector.shape_cast %153 : vector<1x4x48xf32> to vector<4x48xf32>
    %155 = vector.shape_cast %152 : vector<4x48xf32> to vector<1x4x48xf32>
    tpu.vector_store %arg2[%c3_173, %c0_174, %c0_175], %155 {strides = array<i32>} : memref<4x16x48xf32, #tpu.memory_space<vmem>>, vector<1x4x48xf32>,
    %c3_176 = arith.constant 3 : index
    %c16_177 = arith.constant 16 : index
    %c0_178 = arith.constant 0 : index
    %156 = vector.load %arg1[%c3_176, %c16_177, %c0_178] : memref<4x64x12xf32, #tpu.memory_space<vmem>>, vector<1x4x12xf32>
    %157 = vector.shape_cast %156 : vector<1x4x12xf32> to vector<4x12xf32>
    %c3_179 = arith.constant 3 : index
    %c20_180 = arith.constant 20 : index
    %c0_181 = arith.constant 0 : index
    %158 = vector.load %arg1[%c3_179, %c20_180, %c0_181] : memref<4x64x12xf32, #tpu.memory_space<vmem>>, vector<1x4x12xf32>
    %159 = vector.shape_cast %158 : vector<1x4x12xf32> to vector<4x12xf32>
    %c3_182 = arith.constant 3 : index
    %c24_183 = arith.constant 24 : index
    %c0_184 = arith.constant 0 : index
    %160 = vector.load %arg1[%c3_182, %c24_183, %c0_184] : memref<4x64x12xf32, #tpu.memory_space<vmem>>, vector<1x4x12xf32>
    %161 = vector.shape_cast %160 : vector<1x4x12xf32> to vector<4x12xf32>
    %c3_185 = arith.constant 3 : index
    %c28_186 = arith.constant 28 : index
    %c0_187 = arith.constant 0 : index
    %162 = vector.load %arg1[%c3_185, %c28_186, %c0_187] : memref<4x64x12xf32, #tpu.memory_space<vmem>>, vector<1x4x12xf32>
    %163 = vector.shape_cast %162 : vector<1x4x12xf32> to vector<4x12xf32>
    %164 = tpu.concatenate %157, %159, %161, %163 in 1 : vector<4x12xf32>, vector<4x12xf32>, vector<4x12xf32>, vector<4x12xf32> -> vector<4x48xf32>
    %c3_188 = arith.constant 3 : index
    %c4_189 = arith.constant 4 : index
    %c0_190 = arith.constant 0 : index
    %165 = vector.load %arg2[%c3_188, %c4_189, %c0_190] : memref<4x16x48xf32, #tpu.memory_space<vmem>>, vector<1x4x48xf32>
    %166 = vector.shape_cast %165 : vector<1x4x48xf32> to vector<4x48xf32>
    %167 = vector.shape_cast %164 : vector<4x48xf32> to vector<1x4x48xf32>
    tpu.vector_store %arg2[%c3_188, %c4_189, %c0_190], %167 {strides = array<i32>} : memref<4x16x48xf32, #tpu.memory_space<vmem>>, vector<1x4x48xf32>,
    %c3_191 = arith.constant 3 : index
    %c32_192 = arith.constant 32 : index
    %c0_193 = arith.constant 0 : index
    %168 = vector.load %arg1[%c3_191, %c32_192, %c0_193] : memref<4x64x12xf32, #tpu.memory_space<vmem>>, vector<1x4x12xf32>
    %169 = vector.shape_cast %168 : vector<1x4x12xf32> to vector<4x12xf32>
    %c3_194 = arith.constant 3 : index
    %c36_195 = arith.constant 36 : index
    %c0_196 = arith.constant 0 : index
    %170 = vector.load %arg1[%c3_194, %c36_195, %c0_196] : memref<4x64x12xf32, #tpu.memory_space<vmem>>, vector<1x4x12xf32>
    %171 = vector.shape_cast %170 : vector<1x4x12xf32> to vector<4x12xf32>
    %c3_197 = arith.constant 3 : index
    %c40_198 = arith.constant 40 : index
    %c0_199 = arith.constant 0 : index
    %172 = vector.load %arg1[%c3_197, %c40_198, %c0_199] : memref<4x64x12xf32, #tpu.memory_space<vmem>>, vector<1x4x12xf32>
    %173 = vector.shape_cast %172 : vector<1x4x12xf32> to vector<4x12xf32>
    %c3_200 = arith.constant 3 : index
    %c44_201 = arith.constant 44 : index
    %c0_202 = arith.constant 0 : index
    %174 = vector.load %arg1[%c3_200, %c44_201, %c0_202] : memref<4x64x12xf32, #tpu.memory_space<vmem>>, vector<1x4x12xf32>
    %175 = vector.shape_cast %174 : vector<1x4x12xf32> to vector<4x12xf32>
    %176 = tpu.concatenate %169, %171, %173, %175 in 1 : vector<4x12xf32>, vector<4x12xf32>, vector<4x12xf32>, vector<4x12xf32> -> vector<4x48xf32>
    %c3_203 = arith.constant 3 : index
    %c8_204 = arith.constant 8 : index
    %c0_205 = arith.constant 0 : index
    %177 = vector.load %arg2[%c3_203, %c8_204, %c0_205] : memref<4x16x48xf32, #tpu.memory_space<vmem>>, vector<1x4x48xf32>
    %178 = vector.shape_cast %177 : vector<1x4x48xf32> to vector<4x48xf32>
    %179 = vector.shape_cast %176 : vector<4x48xf32> to vector<1x4x48xf32>
    tpu.vector_store %arg2[%c3_203, %c8_204, %c0_205], %179 {strides = array<i32>} : memref<4x16x48xf32, #tpu.memory_space<vmem>>, vector<1x4x48xf32>,
    %c3_206 = arith.constant 3 : index
    %c48_207 = arith.constant 48 : index
    %c0_208 = arith.constant 0 : index
    %180 = vector.load %arg1[%c3_206, %c48_207, %c0_208] : memref<4x64x12xf32, #tpu.memory_space<vmem>>, vector<1x4x12xf32>
    %181 = vector.shape_cast %180 : vector<1x4x12xf32> to vector<4x12xf32>
    %c3_209 = arith.constant 3 : index
    %c52_210 = arith.constant 52 : index
    %c0_211 = arith.constant 0 : index
    %182 = vector.load %arg1[%c3_209, %c52_210, %c0_211] : memref<4x64x12xf32, #tpu.memory_space<vmem>>, vector<1x4x12xf32>
    %183 = vector.shape_cast %182 : vector<1x4x12xf32> to vector<4x12xf32>
    %c3_212 = arith.constant 3 : index
    %c56_213 = arith.constant 56 : index
    %c0_214 = arith.constant 0 : index
    %184 = vector.load %arg1[%c3_212, %c56_213, %c0_214] : memref<4x64x12xf32, #tpu.memory_space<vmem>>, vector<1x4x12xf32>
    %185 = vector.shape_cast %184 : vector<1x4x12xf32> to vector<4x12xf32>
    %c3_215 = arith.constant 3 : index
    %c60_216 = arith.constant 60 : index
    %c0_217 = arith.constant 0 : index
    %186 = vector.load %arg1[%c3_215, %c60_216, %c0_217] : memref<4x64x12xf32, #tpu.memory_space<vmem>>, vector<1x4x12xf32>
    %187 = vector.shape_cast %186 : vector<1x4x12xf32> to vector<4x12xf32>
    %188 = tpu.concatenate %181, %183, %185, %187 in 1 : vector<4x12xf32>, vector<4x12xf32>, vector<4x12xf32>, vector<4x12xf32> -> vector<4x48xf32>
    %c3_218 = arith.constant 3 : index
    %c12_219 = arith.constant 12 : index
    %c0_220 = arith.constant 0 : index
    %189 = vector.load %arg2[%c3_218, %c12_219, %c0_220] : memref<4x16x48xf32, #tpu.memory_space<vmem>>, vector<1x4x48xf32>
    %190 = vector.shape_cast %189 : vector<1x4x48xf32> to vector<4x48xf32>
    %191 = vector.shape_cast %188 : vector<4x48xf32> to vector<1x4x48xf32>
    tpu.vector_store %arg2[%c3_218, %c12_219, %c0_220], %191 {strides = array<i32>} : memref<4x16x48xf32, #tpu.memory_space<vmem>>, vector<1x4x48xf32>,
    return
  }
  func.func @transform_0(%arg0: i32) -> (i32, i32, i32) {
    %c0_i32 = arith.constant 0 : i32
    %c0_i32_0 = arith.constant 0 : i32
    %c0_i32_1 = arith.constant 0 : i32
    return %arg0, %c0_i32, %c0_i32_0 : i32, i32, i32
  }
  func.func @transform_1(%arg0: i32) -> (i32, i32, i32) {
    %c0_i32 = arith.constant 0 : i32
    %c0_i32_0 = arith.constant 0 : i32
    %c0_i32_1 = arith.constant 0 : i32
    return %arg0, %c0_i32, %c0_i32_0 : i32, i32, i32
  }
}

</mosaic_0001>

<bundles_post_ra>
// kernel: tpu_custom_call.1
= control target key start
LH: loop header
LB: loop body
LE: loop exit
PB: predicated region body
PF: predicated region fallthrough
CT: control target
= control target key end

     0   :  { %6 = vsyncpa [#allocation3], 0  ;;  %s1032_s0 = inlined_call_operand.vmem [shape: f32[8,64,12], index: 0, kind: input, shape index: {}]   ;;  %s1033_s1 = inlined_call_operand.hbm [shape: f32[8,16,48], index: 1, kind: output, shape index: {}]  }
   0x1   :  { %8 = vsyncpa [#allocation3 + $0x1], 0  ;;  %s729_s6 = smov 0   ;;  %s731_s7 = smov 0  }
   0x2   :  { %s733_s8 = smov 0   ;;  %s735_s9 = smov 0  }
   0x3 LB: > { %s750_s10 = sadd.s32 4294967295, %s711_s9   ;;  %s528_s11 = sadd.s32 4294967294, %s711_s9   ;;  %s711_s9 = sphi %s735_s9, %s1039_s9   ;;  %s707_s8 = sphi %s733_s8, %s1038_s8   ;;  %s703_s7 = sphi %s731_s7, %s1037_s7   ;;  %s699_s6 = sphi %s729_s6, %s1036_s6  }
   0x4   : > { %s754_s12 = sadd.s32 1, %s711_s9   ;;  %s47_s13 = sadd.s32 1, %s707_s8 }
   0x5   : > { %s44_s14 = ssub.s32 %s711_s9, %s754_s12  ;;  %p57_p0 = scmp.ne.s32.totalorder %s707_s8, %s703_s7 }
   0x6   : > { %p45_p1 = scmp.eq.s32.totalorder %s44_s14, 0  ;;  %p58_p2 = scmp.eq.s32.totalorder %s750_s10, 1 }
   0x7   : > { %p63_p3 = scmp.ne.s32.totalorder %s703_s7, %s699_s6  ;;  %p64_p4 = scmp.eq.s32.totalorder %s528_s11, 1 }
   0x8   : > { %s765_s15 = scalar_select %p45_p1, %s707_s8, %s47_s13  }
   0x9   : > { %p767_p5 = por %p58_p2, %p57_p0  ;;  %p771_p6 = por %p64_p4, %p63_p3 }
   0xa   : > { %p531_p7 = scmp.ge.s32.totalorder %s711_s9, 1  ;;  %p92_p8 = scmp.lt.s32.totalorder %s711_s9, 3 }
   0xc   : > { %p93_p9 = pnand %p531_p7, %p92_p8 }
   0xd   : > { %s533_s18 = sshll.u32 (!%p93_p9), %s750_s10, 2  ;;  %s713_s23 = smov (!%p93_p9), 36   ;;  %vm137_vm0 = vcmask (!%p93_p9), 97280   ;;  %vm139_vm1 = vcmask (!%p93_p9), 195584   ;;  %vm141_vm2 = vcmask (!%p93_p9), 293888   ;;  %vm143_vm3 = vcmask (!%p93_p9), 388096  }
   0xe   : > { %96 = sbr.rel (%p93_p9) target bundleno = 248 (0xf8), region = 24  ;;  %p114_p10 = scmp.lt.s32.totalorder (!%p93_p9), %s533_s18, 7 }
   0xf   : > { %s714_s24 = smov (!%p93_p9), 12   ;;  %s715_s25 = smov (!%p93_p9), 24  }
  0x10   : > { %s110_s26 = sand.u32 (!%p93_p9), 1, %s703_s7   ;;  %s604_s29 = sshll.u32 (!%p93_p9), %s750_s10, 10 }
  0x11   : > { %s532_s27 = sshll.u32 (!%p93_p9), %s110_s26, 6  ;;  %s977_s4 = scalar_lea.hbm (!%p93_p9), %s1033_s1, %s604_s29 }
  0x12   : > { %s887_s28 = scalar_lea.vmem (!%p93_p9), [#allocation2], %s532_s27  ;;  %s991_s5 = scalar_lea.sflag (!%p93_p9), [#allocation3], %s110_s26 }
  0x13   : > { %s466_s30 = sshll.u32 (!%p93_p9), %s887_s28, 4  ;;  %s716_s11 = smov (!%p93_p9), [#allocation2]   ;;  %s979_s30 = int_to_ptr.vmem [resolvable:$true] %s466_s30 }
  0x14   : > { %s649_s10 = scalar_lea.vmem (!%p93_p9), %s979_s30, 1024  ;;  %s653_s13 = sshll.u32 (!%p93_p9), %s716_s11, 4  ;;  %s654_s13 = int_to_ptr.vmem [resolvable:$false] %s653_s13 }
  0x15   : > { %s1041_s18 = smov (!%p114_p10, %s533_s18), 7  ;;  %p650_p11 = scmp.ne.s32.totalorder %s979_s30, %s649_s10 }
  0x16   : > { %s602_s19 = sshll.u32 %s1041_s18, 6  ;;  %s655_s14 = scalar_lea.vmem %s654_s13, 2048 }
  0x17   : > { %s781_s22 = scalar_lea.vmem %s1032_s0, %s602_s19  ;;  %p651_p12 = pnand %p650_p11, %p767_p5 }
  0x18   : > { %v124_v0 = vld [vmem:[%s781_s22 + $0xc] sm:$0xf]  ;;  %v122_v1 = vld [vmem:[%s781_s22 + $0x4] sm:$0xf]  ;;  %v146_v2 = vld [vmem:[%s781_s22 + $0x14] sm:$0xf]  ;;  %p656_p0 = scmp.lt.s32.totalorder %s979_s30, %s654_s13  ;;  %p657_p1 = scmp.lt.s32.totalorder %s655_s14, %s649_s10 }
  0x19   : > { %134 = vrot.lane.b32.xlu1 %v124_v0, %s713_s23  ;;  %126 = vrot.lane.b32.xlu0 %v122_v1, %s714_s24  ;;  %v123_v3 = vld [vmem:[%s781_s22 + $0x8] sm:$0xf]  ;;  %v148_v4 = vld [vmem:[%s781_s22 + $0x1c] sm:$0xf]  ;;  %p652_p13 = pneg %p651_p12 }
  0x1a   : > { %v147_v5 = vld [vmem:[%s781_s22 + $0x18] sm:$0xf]  ;;  %v167_v6 = vld [vmem:[%s781_s22 + $0x28] sm:$0xf]  ;;  %v166_v7 = vld [vmem:[%s781_s22 + $0x24] sm:$0xf]  ;;  %p658_p2 = por %p657_p1, %p656_p0 }
  0x1b   : > { %v186_v8 = vld [vmem:[%s781_s22 + $0x34] sm:$0xf]  ;;  %v168_v9 = vld [vmem:[%s781_s22 + $0x2c] sm:$0xf]  ;;  %v188_v10 = vld [vmem:[%s781_s22 + $0x3c] sm:$0xf] }
  0x1c   : > { %v187_v11 = vld [vmem:[%s781_s22 + $0x38] sm:$0xf]  ;;  %v538_v12 = vld [vmem:[%s781_s22 + $0x48] sm:$0xf]  ;;  %v537_v13 = vld [vmem:[%s781_s22 + $0x44] sm:$0xf]  ;;  %p659_p3 = pnand %p658_p2, %p652_p13 }
  0x1d   : > { %150 = vrot.lane.b32.xlu1 %v146_v2, %s714_s24  ;;  %130 = vrot.lane.b32.xlu0 %v123_v3, %s715_s25  ;;  %v542_v14 = vld [vmem:[%s781_s22 + $0x54] sm:$0xf]  ;;  %v539_v15 = vld [vmem:[%s781_s22 + $0x4c] sm:$0xf] }
  0x1e   : > { %v547_v16 = vld [vmem:[%s781_s22 + $0x64] sm:$0xf]  ;;  %v543_v17 = vld [vmem:[%s781_s22 + $0x58] sm:$0xf]  ;;  %v552_v19 = vld [vmem:[%s781_s22 + $0x74] sm:$0xf] }
  0x1f   : > { %v557_v18 = vld [vmem:[%s781_s22 + $0x84] sm:$0xf]  ;;  %v562_v21 = vld [vmem:[%s781_s22 + $0x94] sm:$0xf]  ;;  %v548_v26 = vld [vmem:[%s781_s22 + $0x68] sm:$0xf] }
  0x20   : > { %v567_v20 = vld [vmem:[%s781_s22 + $0xa4] sm:$0xf]  ;;  %v572_v23 = vld [vmem:[%s781_s22 + $0xb4] sm:$0xf]  ;;  %v558_v28 = vld [vmem:[%s781_s22 + $0x88] sm:$0xf] }
  0x21   : > { %158 = vrot.lane.b32.xlu1 %v148_v4, %s713_s23  ;;  %154 = vrot.lane.b32.xlu0 %v147_v5, %s715_s25  ;;  %v577_v22 = vld [vmem:[%s781_s22 + $0xc4] sm:$0xf]  ;;  %v582_v25 = vld [vmem:[%s781_s22 + $0xd4] sm:$0xf] }
  0x22   : > { %v587_v24 = vld [vmem:[%s781_s22 + $0xe4] sm:$0xf]  ;;  %v592_v27 = vld [vmem:[%s781_s22 + $0xf4] sm:$0xf]  ;;  %v553_v29 = vld [vmem:[%s781_s22 + $0x78] sm:$0xf] }
  0x23   : > { %v568_v30 = vld [vmem:[%s781_s22 + $0xa8] sm:$0xf]  ;;  %v563_v31 = vld [vmem:[%s781_s22 + $0x98] sm:$0xf]  ;;  %v544_v36 = vld [vmem:[%s781_s22 + $0x5c] sm:$0xf] }
  0x24   : > { %v578_v32 = vld [vmem:[%s781_s22 + $0xc8] sm:$0xf]  ;;  %v573_v33 = vld [vmem:[%s781_s22 + $0xb8] sm:$0xf]  ;;  %v554_v38 = vld [vmem:[%s781_s22 + $0x7c] sm:$0xf] }
  0x25   : > { %174 = vrot.lane.b32.xlu1 %v167_v6, %s715_s25  ;;  %170 = vrot.lane.b32.xlu0 %v166_v7, %s714_s24  ;;  %v588_v34 = vld [vmem:[%s781_s22 + $0xe8] sm:$0xf]  ;;  %v583_v35 = vld [vmem:[%s781_s22 + $0xd8] sm:$0xf] }
  0x26   : > { %v593_v37 = vld [vmem:[%s781_s22 + $0xf8] sm:$0xf]  ;;  %v549_v39 = vld [vmem:[%s781_s22 + $0x6c] sm:$0xf]  ;;  %v564_v40 = vld [vmem:[%s781_s22 + $0x9c] sm:$0xf] }
  0x27   : > { %v559_v41 = vld [vmem:[%s781_s22 + $0x8c] sm:$0xf]  ;;  %v574_v42 = vld [vmem:[%s781_s22 + $0xbc] sm:$0xf]  ;;  %v121_v50 = vld [vmem:[%s781_s22] sm:$0xf] }
  0x28   : > { %v569_v43 = vld [vmem:[%s781_s22 + $0xac] sm:$0xf]  ;;  %v584_v44 = vld [vmem:[%s781_s22 + $0xdc] sm:$0xf]  ;;  %v145_v54 = vld [vmem:[%s781_s22 + $0x10] sm:$0xf] }
  0x29   : > { %190 = vrot.lane.b32.xlu1 %v186_v8, %s714_s24  ;;  %178 = vrot.lane.b32.xlu0 %v168_v9, %s713_s23  ;;  %v579_v45 = vld [vmem:[%s781_s22 + $0xcc] sm:$0xf]  ;;  %v594_v46 = vld [vmem:[%s781_s22 + $0xfc] sm:$0xf] }
  0x2a   : > { %v589_v47 = vld [vmem:[%s781_s22 + $0xec] sm:$0xf]  ;;  %v165_v62 = vld [vmem:[%s781_s22 + $0x20] sm:$0xf]  ;;  %v185_v5 = vld [vmem:[%s781_s22 + $0x30] sm:$0xf] }
  0x2d   : > { %198 = vrot.lane.b32.xlu1 %v188_v10, %s713_s23  ;;  %194 = vrot.lane.b32.xlu0 %v187_v11, %s715_s25 }
  0x31   : > { %215 = vrot.lane.b32.xlu1 %v538_v12, %s715_s25  ;;  %211 = vrot.lane.b32.xlu0 %v537_v13, %s714_s24  ;;  %v536_v12 = vld [vmem:[%s781_s22 + $0x40] sm:$0xf] }
  0x35   : > { %232 = vrot.lane.b32.xlu1 %v542_v14, %s714_s24  ;;  %219 = vrot.lane.b32.xlu0 %v539_v15, %s713_s23 }
  0x39   : > { %252 = vrot.lane.b32.xlu1 %v547_v16, %s714_s24  ;;  %236 = vrot.lane.b32.xlu0 %v543_v17, %s715_s25  ;;  %v541_v16 = vld [vmem:[%s781_s22 + $0x50] sm:$0xf] }
  0x3d   : > { %293 = vrot.lane.b32.xlu1 %v557_v18, %s714_s24  ;;  %272 = vrot.lane.b32.xlu0 %v552_v19, %s714_s24 }
  0x41   : > { %334 = vrot.lane.b32.xlu1 %v567_v20, %s714_s24  ;;  %314 = vrot.lane.b32.xlu0 %v562_v21, %s714_s24 }
  0x45   : > { %375 = vrot.lane.b32.xlu1 %v577_v22, %s714_s24  ;;  %354 = vrot.lane.b32.xlu0 %v572_v23, %s714_s24  ;;  %v546_v22 = vld [vmem:[%s781_s22 + $0x60] sm:$0xf] }
  0x49   : > { %416 = vrot.lane.b32.xlu1 %v587_v24, %s714_s24  ;;  %396 = vrot.lane.b32.xlu0 %v582_v25, %s714_s24 }
  0x4d   : > { %256 = vrot.lane.b32.xlu1 %v548_v26, %s715_s25  ;;  %436 = vrot.lane.b32.xlu0 %v592_v27, %s714_s24  ;;  %v556_v26 = vld [vmem:[%s781_s22 + $0x80] sm:$0xf]  ;;  %v551_v27 = vld [vmem:[%s781_s22 + $0x70] sm:$0xf] }
  0x51   : > { %297 = vrot.lane.b32.xlu1 %v558_v28, %s715_s25  ;;  %276 = vrot.lane.b32.xlu0 %v553_v29, %s715_s25 }
  0x55   : > { %338 = vrot.lane.b32.xlu1 %v568_v30, %s715_s25  ;;  %318 = vrot.lane.b32.xlu0 %v563_v31, %s715_s25 }
  0x59   : > { %379 = vrot.lane.b32.xlu1 %v578_v32, %s715_s25  ;;  %358 = vrot.lane.b32.xlu0 %v573_v33, %s715_s25  ;;  %v566_v32 = vld [vmem:[%s781_s22 + $0xa0] sm:$0xf]  ;;  %v561_v33 = vld [vmem:[%s781_s22 + $0x90] sm:$0xf] }
  0x5d   : > { %420 = vrot.lane.b32.xlu1 %v588_v34, %s715_s25  ;;  %400 = vrot.lane.b32.xlu0 %v583_v35, %s715_s25 }
  0x61   : > { %240 = vrot.lane.b32.xlu1 %v544_v36, %s713_s23  ;;  %440 = vrot.lane.b32.xlu0 %v593_v37, %s715_s25 }
  0x65   : > { %280 = vrot.lane.b32.xlu1 %v554_v38, %s713_s23  ;;  %260 = vrot.lane.b32.xlu0 %v549_v39, %s713_s23  ;;  %v576_v38 = vld [vmem:[%s781_s22 + $0xc0] sm:$0xf]  ;;  %v571_v39 = vld [vmem:[%s781_s22 + $0xb0] sm:$0xf] }
  0x69   : > { %322 = vrot.lane.b32.xlu1 %v564_v40, %s713_s23  ;;  %301 = vrot.lane.b32.xlu0 %v559_v41, %s713_s23 }
  0x6d   : > { %362 = vrot.lane.b32.xlu1 %v574_v42, %s713_s23  ;;  %342 = vrot.lane.b32.xlu0 %v569_v43, %s713_s23 }
  0x71   : > { %404 = vrot.lane.b32.xlu1 %v584_v44, %s713_s23  ;;  %383 = vrot.lane.b32.xlu0 %v579_v45, %s713_s23  ;;  %v586_v44 = vld [vmem:[%s781_s22 + $0xe0] sm:$0xf]  ;;  %v581_v45 = vld [vmem:[%s781_s22 + $0xd0] sm:$0xf] }
  0x75   : > { %444 = vrot.lane.b32.xlu1 %v594_v46, %s713_s23  ;;  %424 = vrot.lane.b32.xlu0 %v589_v47, %s713_s23 }
  0x8b   : > { %v135_v48 = vpop.permute.xlu1 %134  ;;  %v127_v49 = vpop.permute.xlu0 %126 }
  0x8c   : > { %v138_v51 = vsel %vm137_vm0, %v121_v50, %v127_v49  ;;  %v591_v50 = vld [vmem:[%s781_s22 + $0xf0] sm:$0xf] }
  0x8f   : > { %v151_v52 = vpop.permute.xlu1 %150  ;;  %v131_v53 = vpop.permute.xlu0 %130 }
  0x90   : > { %v140_v55 = vsel %vm139_vm1, %v138_v51, %v131_v53  ;;  %v161_v57 = vsel %vm137_vm0, %v145_v54, %v151_v52 }
  0x91   : > { %v142_v56 = vsel %vm141_vm2, %v140_v55, %v135_v48 }
  0x92   : > { %144 = vst.msk [vmem:[%s887_s28] sm:$0xf] %vm143_vm3, %v142_v56 }
  0x93   : > { %v159_v58 = vpop.permute.xlu1 %158  ;;  %v155_v59 = vpop.permute.xlu0 %154 }
  0x94   : > { %v162_v60 = vsel %vm139_vm1, %v161_v57, %v155_v59 }
  0x95   : > { %v163_v61 = vsel %vm141_vm2, %v162_v60, %v159_v58 }
  0x96   : > { %164 = vst.msk [vmem:[%s887_s28 + $0x4] sm:$0xf] %vm143_vm3, %v163_v61 }
  0x97   : > { %v175_v63 = vpop.permute.xlu1 %174  ;;  %v171_v0 = vpop.permute.xlu0 %170 }
  0x98   : > { %v181_v1 = vsel %vm137_vm0, %v165_v62, %v171_v0 }
  0x99   : > { %v182_v3 = vsel %vm139_vm1, %v181_v1, %v175_v63 }
  0x9b   : > { %v191_v2 = vpop.permute.xlu1 %190  ;;  %v179_v4 = vpop.permute.xlu0 %178 }
  0x9c   : > { %v183_v6 = vsel %vm141_vm2, %v182_v3, %v179_v4  ;;  %v201_v7 = vsel %vm137_vm0, %v185_v5, %v191_v2 }
  0x9d   : > { %184 = vst.msk [vmem:[%s887_s28 + $0x8] sm:$0xf] %vm143_vm3, %v183_v6 }
  0x9f   : > { %v199_v8 = vpop.permute.xlu1 %198  ;;  %v195_v9 = vpop.permute.xlu0 %194 }
  0xa0   : > { %v202_v10 = vsel %vm139_vm1, %v201_v7, %v195_v9 }
  0xa1   : > { %v203_v11 = vsel %vm141_vm2, %v202_v10, %v199_v8 }
  0xa2   : > { %204 = vst.msk [vmem:[%s887_s28 + $0xc] sm:$0xf] %vm143_vm3, %v203_v11 }
  0xa3   : > { %v216_v13 = vpop.permute.xlu1 %215  ;;  %v212_v14 = vpop.permute.xlu0 %211 }
  0xa4   : > { %v222_v15 = vsel %vm137_vm0, %v536_v12, %v212_v14 }
  0xa5   : > { %v223_v18 = vsel %vm139_vm1, %v222_v15, %v216_v13 }
  0xa7   : > { %v233_v17 = vpop.permute.xlu1 %232  ;;  %v220_v19 = vpop.permute.xlu0 %219 }
  0xa8   : > { %v243_v20 = vsel %vm137_vm0, %v541_v16, %v233_v17  ;;  %v224_v21 = vsel %vm141_vm2, %v223_v18, %v220_v19 }
  0xa9   : > { %540 = vst.msk [vmem:[%s887_s28 + $0x10] sm:$0xf] %vm143_vm3, %v224_v21 }
  0xab   : > { %v253_v23 = vpop.permute.xlu1 %252  ;;  %v237_v24 = vpop.permute.xlu0 %236 }
  0xac   : > { %v263_v25 = vsel %vm137_vm0, %v546_v22, %v253_v23  ;;  %v244_v62 = vsel %vm139_vm1, %v243_v20, %v237_v24 }
  0xaf   : > { %v294_v28 = vpop.permute.xlu1 %293  ;;  %v273_v29 = vpop.permute.xlu0 %272 }
  0xb0   : > { %v304_v30 = vsel %vm137_vm0, %v556_v26, %v294_v28  ;;  %v283_v31 = vsel %vm137_vm0, %v551_v27, %v273_v29 }
  0xb3   : > { %v335_v34 = vpop.permute.xlu1 %334  ;;  %v315_v35 = vpop.permute.xlu0 %314 }
  0xb4   : > { %v345_v36 = vsel %vm137_vm0, %v566_v32, %v335_v34  ;;  %v325_v37 = vsel %vm137_vm0, %v561_v33, %v315_v35 }
  0xb7   : > { %v376_v40 = vpop.permute.xlu1 %375  ;;  %v355_v41 = vpop.permute.xlu0 %354 }
  0xb8   : > { %v386_v42 = vsel %vm137_vm0, %v576_v38, %v376_v40  ;;  %v365_v43 = vsel %vm137_vm0, %v571_v39, %v355_v41 }
  0xbb   : > { %v417_v46 = vpop.permute.xlu1 %416  ;;  %v397_v47 = vpop.permute.xlu0 %396 }
  0xbc   : > { %v427_v48 = vsel %vm137_vm0, %v586_v44, %v417_v46  ;;  %v407_v49 = vsel %vm137_vm0, %v581_v45, %v397_v47 }
  0xbf   : > { %v257_v51 = vpop.permute.xlu1 %256  ;;  %v437_v52 = vpop.permute.xlu0 %436 }
  0xc0   : > { %v447_v53 = vsel %vm137_vm0, %v591_v50, %v437_v52  ;;  %v264_v2 = vsel %vm139_vm1, %v263_v25, %v257_v51 }
  0xc3   : > { %v298_v54 = vpop.permute.xlu1 %297  ;;  %v277_v55 = vpop.permute.xlu0 %276 }
  0xc4   : > { %v284_v3 = vsel %vm139_vm1, %v283_v31, %v277_v55  ;;  %v305_v8 = vsel %vm139_vm1, %v304_v30, %v298_v54 }
  0xc7   : > { %v339_v56 = vpop.permute.xlu1 %338  ;;  %v319_v57 = vpop.permute.xlu0 %318 }
  0xc8   : > { %v326_v9 = vsel %vm139_vm1, %v325_v37, %v319_v57  ;;  %v346_v14 = vsel %vm139_vm1, %v345_v36, %v339_v56 }
  0xcb   : > { %v380_v58 = vpop.permute.xlu1 %379  ;;  %v359_v59 = vpop.permute.xlu0 %358 }
  0xcc   : > { %v366_v15 = vsel %vm139_vm1, %v365_v43, %v359_v59  ;;  %v387_v20 = vsel %vm139_vm1, %v386_v42, %v380_v58 }
  0xcf   : > { %v421_v60 = vpop.permute.xlu1 %420  ;;  %v401_v61 = vpop.permute.xlu0 %400 }
  0xd0   : > { %v408_v21 = vsel %vm139_vm1, %v407_v49, %v401_v61  ;;  %v428_v26 = vsel %vm139_vm1, %v427_v48, %v421_v60 }
  0xd3   : > { %v241_v63 = vpop.permute.xlu1 %240  ;;  %v441_v0 = vpop.permute.xlu0 %440 }
  0xd4   : > { %v245_v1 = vsel %vm141_vm2, %v244_v62, %v241_v63  ;;  %v448_v27 = vsel %vm139_vm1, %v447_v53, %v441_v0 }
  0xd5   : > { %545 = vst.msk [vmem:[%s887_s28 + $0x14] sm:$0xf] %vm143_vm3, %v245_v1 }
  0xd7   : > { %v281_v4 = vpop.permute.xlu1 %280  ;;  %v261_v5 = vpop.permute.xlu0 %260 }
  0xd8   : > { %v285_v6 = vsel %vm141_vm2, %v284_v3, %v281_v4  ;;  %v265_v7 = vsel %vm141_vm2, %v264_v2, %v261_v5 }
  0xd9   : > { %555 = vst.msk [vmem:[%s887_s28 + $0x1c] sm:$0xf] %vm143_vm3, %v285_v6  ;;  %550 = vst.msk [vmem:[%s887_s28 + $0x18] sm:$0xf] %vm143_vm3, %v265_v7 }
  0xdb   : > { %v323_v10 = vpop.permute.xlu1 %322  ;;  %v302_v11 = vpop.permute.xlu0 %301 }
  0xdc   : > { %v327_v12 = vsel %vm141_vm2, %v326_v9, %v323_v10  ;;  %v306_v13 = vsel %vm141_vm2, %v305_v8, %v302_v11 }
  0xdd   : > { %565 = vst.msk [vmem:[%s887_s28 + $0x24] sm:$0xf] %vm143_vm3, %v327_v12  ;;  %560 = vst.msk [vmem:[%s887_s28 + $0x20] sm:$0xf] %vm143_vm3, %v306_v13 }
  0xdf   : > { %v363_v16 = vpop.permute.xlu1 %362  ;;  %v343_v17 = vpop.permute.xlu0 %342 }
  0xe0   : > { %v367_v18 = vsel %vm141_vm2, %v366_v15, %v363_v16  ;;  %v347_v19 = vsel %vm141_vm2, %v346_v14, %v343_v17 }
  0xe1   : > { %575 = vst.msk [vmem:[%s887_s28 + $0x2c] sm:$0xf] %vm143_vm3, %v367_v18  ;;  %570 = vst.msk [vmem:[%s887_s28 + $0x28] sm:$0xf] %vm143_vm3, %v347_v19 }
  0xe3   : > { %v405_v22 = vpop.permute.xlu1 %404  ;;  %v384_v23 = vpop.permute.xlu0 %383 }
  0xe4   : > { %v409_v24 = vsel %vm141_vm2, %v408_v21, %v405_v22  ;;  %v388_v25 = vsel %vm141_vm2, %v387_v20, %v384_v23 }
  0xe5   : > { %585 = vst.msk [vmem:[%s887_s28 + $0x34] sm:$0xf] %vm143_vm3, %v409_v24  ;;  %580 = vst.msk [vmem:[%s887_s28 + $0x30] sm:$0xf] %vm143_vm3, %v388_v25 }
  0xe7   : > { %v445_v28 = vpop.permute.xlu1 %444  ;;  %v425_v29 = vpop.permute.xlu0 %424 }
  0xe8   : > { %v449_v30 = vsel %vm141_vm2, %v448_v27, %v445_v28  ;;  %v429_v31 = vsel %vm141_vm2, %v428_v26, %v425_v29 }
  0xe9   : > { %595 = vst.msk [vmem:[%s887_s28 + $0x3c] sm:$0xf] %vm143_vm3, %v449_v30  ;;  %590 = vst.msk [vmem:[%s887_s28 + $0x38] sm:$0xf] %vm143_vm3, %v429_v31 }
  0xea   : > { %662 = shalt.err (!%p659_p3)
}
  0xeb   : > { %s663_s18 = scalar_lea.hbm %s977_s4, 1024  ;;  %s667_s21 = scalar_lea.hbm %s1033_s1, 2048 }
  0xec   : > { %p664_p4 = scmp.ne.s32.totalorder %s977_s4, %s663_s18  ;;  %p668_p9 = scmp.lt.u32.totalorder %s977_s4, %s1033_s1 }
  0xed   : > { %p669_p10 = scmp.lt.u32.totalorder %s667_s21, %s663_s18  ;;  %p671_p12 = scmp.lt.u32.totalorder %s663_s18, %s977_s4 }
  0xee   : > { %p665_p7 = pnand %p664_p4, %p767_p5 }
  0xef   : > { %p670_p11 = por %p669_p10, %p668_p9 }
  0xf0   : > { %p666_p8 = pneg %p665_p7 }
  0xf1   : > { %p672_p13 = por %p671_p12, %p670_p11 }
  0xf3   : > { %p673_p0 = pnand %p672_p13, %p666_p8 }
  0xf5   : > { %676 = shalt.err (!%p673_p0)
}
  0xf6   : > { %s717_s24 = smov 128   ;;  %s718_s25 = smov 8  }
  0xf7   : > { %605 = dma.vmem_to_hbm [thread:$0]  (%p767_p5), %s979_s30, 1024, %s977_s4, %s991_s5, %s717_s24, %s717_s24, %s718_s25  }
  0xf8 PF: > { %p611_p1 = scmp.ge.s32.totalorder %s711_s9, 2  ;;  %s481_s26 = sand.u32 1, %s699_s6  }
  0xf9   : > { %s482_s27 = scalar_lea.sflag [#allocation3], %s481_s26 }
  0xfa   : > { %p608_p2 = pnand %p611_p1, %p771_p6 }
  0xfc   : > { %694 = dma.done.wait (!%p608_p2), %s482_s27, 1024  }
  0xfd   : > { %696 = vsyncadd (!%p608_p2), %s482_s27, 4294966272  ;;  %p11_p3 = scmp.ge.s32.totalorder %s754_s12, 4   ;;  %s1036_s6 = smov %s703_s7 }
  0xfe   : > { %s1037_s7 = smov %s707_s8  ;;  %s1038_s8 = smov %s765_s15 }
  0xff   : > { %s1039_s9 = smov %s754_s12  ;;  %13 = sbr.rel (!%p11_p3) target bundleno = 3 (0x3), region = 65 }
 0x106   :  { %487 = vsyncpa [#allocation3], 1 }
 0x107   :  { %489 = vsyncpa [#allocation3 + $0x1], 1 }

</bundles_post_ra>
